<compile_context>
chip_gen: v5e
topology: v5e:2x2
jax: 0.10.0
libtpu: 0.0.40
codegen_flags: <defaults>
</compile_context>

<pallas_src>
import functools

import numpy as np

import jax
import jax.numpy as jnp
from jax import lax
from jax.experimental import pallas as pl
from jax.experimental.pallas import tpu as pltpu


def _conv_bn_relu_kernel(mask_ref, x_ref, w_ref, b_ref, o_ref,
                         *, H, W, KH, KW, pad, Nb):
    """One batch-block per grid step (NCHW, spatial flattened onto lanes).

    mask_ref : (KH*KW, H*W)      precomputed 0/1 boundary masks (grid-invariant)
    x_ref    : (Nb, Cin, H*W)    input block, H*W on lanes (lane-dense)
    w_ref    : (KH*KW, Cout, Cin) BN-scale-folded per-tap conv weights
    b_ref    : (Cout, 1)         folded conv-bias + BN bias
    o_ref    : (Nb, Cout, H*W)   output block, NCHW-flattened (lane-dense stores)
    """
    HW = H * W

    # Hoisted once per grid step (tiny, grid-invariant inputs).
    masks = mask_ref[...]          # (KH*KW, HW)
    w_taps = w_ref[...]            # (KH*KW, Cout, Cin)
    bias = b_ref[...]              # (Cout, 1)

    def one_element(b, carry):
        x = x_ref[b]               # (Cin, HW) f32
        acc = None
        for kh in range(KH):
            dh = kh - pad
            for kw in range(KW):
                dw = kw - pad
                k = kh * KW + kw
                delta = dh * W + dw
                if delta == 0:
                    # Center tap of a "same" conv: no shift, mask is all-ones.
                    tap = x
                else:
                    # Lane roll (XLU) + precomputed boundary mask (1 VPU mult).
                    shifted = pltpu.roll(x, shift=(-delta) % HW, axis=1)
                    tap = shifted * masks[k:k + 1, :]          # bcast over Cin
                # Consume the tap immediately: (Cout,Cin) x (Cin,HW) on the MXU.
                contrib = jnp.dot(w_taps[k], tap,
                                  preferred_element_type=jnp.float32)
                acc = contrib if acc is None else acc + contrib
        y = jnp.maximum(acc + bias, 0.0)                       # fused bias+ReLU
        o_ref[b] = y.astype(o_ref.dtype)                       # 256-lane dense vst
        return carry

    if Nb <= 8:
        for b in range(Nb):                                    # fully unrolled
            one_element(b, None)
    else:
        lax.fori_loop(0, Nb, one_element, None)                # bounded live ranges


def _pick_batch_block(N, cap=256):
    """Batch elements per grid step.

    Keeps >= 2 grid steps when N >= 2 (feeds both v7x TensorCores under the
    "parallel" marking; harmless 1-extra-step on single-TC v5e/v6e), and caps
    the block at 256 elements (~6 MiB double-buffered in+out) so it fits the
    16 MiB scoped-VMEM default on v5e without raising vmem_limit_bytes.
    Returns a divisor of N so every block is full.
    """
    if N <= 1:
        return max(N, 1)
    nb = min(cap, (N + 1) // 2)
    while N % nb:
        nb -= 1
    return nb


def conv_block_forward(x_nchw, w_oihw, conv_b, gamma, beta, run_mean, run_var,
                       *, padding=1, eps=1e-5):
    """ConvBlock.forward: relu(batch_norm(conv(x))).  Input/output NCHW float32."""
    N, Cin, H, W = x_nchw.shape
    Cout, _, KH, KW = w_oihw.shape
    p = padding
    Ho = H + 2 * p - KH + 1
    Wo = W + 2 * p - KW + 1
    if Ho != H or Wo != W:
        # TODO(synk): only "same"-size convolutions (2*padding == kernel-1) are
        # handled by the in-kernel roll+mask padding; GobangNNet2 uses 3x3/pad=1.
        raise NotImplementedError("requires 2*padding == kernel_size - 1")

    # --- tiny parameter prep (plain JAX / numpy, O(Cout*Cin*KH*KW) elements) ---
    bn_scale = gamma / jnp.sqrt(run_var + eps)                         # (Cout,)
    w_scaled = w_oihw * bn_scale[:, None, None, None]                  # fold BN scale into W
    # per-tap weights: w_taps[kh*KW+kw] = W[:, :, kh, kw]  -> (KH*KW, Cout, Cin)
    w_taps = jnp.transpose(w_scaled, (2, 3, 0, 1)).reshape(KH * KW, Cout, Cin)
    w_taps = w_taps.astype(jnp.float32)
    fused_bias = (beta + (conv_b - run_mean) * bn_scale).reshape(Cout, 1).astype(jnp.float32)

    # --- precomputed 0/1 boundary masks, one row per tap (compile-time constant) ---
    mask_np = np.zeros((KH * KW, H * W), np.float32)
    hh = np.arange(H)[:, None]
    ww = np.arange(W)[None, :]
    for kh in range(KH):
        for kw in range(KW):
            dh, dw = kh - p, kw - p
            valid = ((hh + dh >= 0) & (hh + dh < H) &
                     (ww + dw >= 0) & (ww + dw < W))
            mask_np[kh * KW + kw] = valid.reshape(-1).astype(np.float32)
    masks = jnp.asarray(mask_np)

    # --- free (contiguous) reshape: NCHW with H*W flattened onto lanes ---
    x_flat = x_nchw.reshape(N, Cin, H * W).astype(jnp.float32)

    Nb = _pick_batch_block(N)
    num_blocks = N // Nb

    kernel = functools.partial(_conv_bn_relu_kernel, H=H, W=W, KH=KH, KW=KW,
                               pad=p, Nb=Nb)

    out_flat = pl.pallas_call(
        kernel,
        out_shape=jax.ShapeDtypeStruct((N, Cout, Ho * Wo), jnp.float32),
        grid_spec=pltpu.PrefetchScalarGridSpec(
            num_scalar_prefetch=0,
            grid=(num_blocks,),   # >=2 parallel steps when N>=2 (v7x megacore)
            in_specs=[
                pl.BlockSpec((KH * KW, H * W), lambda n: (0, 0)),         # masks (resident)
                pl.BlockSpec((Nb, Cin, H * W), lambda n: (n, 0, 0)),      # x block
                pl.BlockSpec((KH * KW, Cout, Cin), lambda n: (0, 0, 0)),  # weights (resident)
                pl.BlockSpec((Cout, 1), lambda n: (0, 0)),                # bias (resident)
            ],
            out_specs=pl.BlockSpec((Nb, Cout, Ho * Wo), lambda n: (n, 0, 0)),
        ),
        compiler_params=pltpu.CompilerParams(dimension_semantics=("parallel",)),
    )(masks, x_flat, w_taps, fused_bias)

    return out_flat.reshape(N, Cout, Ho, Wo)   # free reshape, already NCHW


def _reference(x_nchw, w_oihw, conv_b, gamma, beta, run_mean, run_var,
               *, padding=1, eps=1e-5):
    """Pure-JAX reference (same eval-mode semantics) for correctness check."""
    y = lax.conv_general_dilated(
        x_nchw, w_oihw, window_strides=(1, 1),
        padding=[(padding, padding), (padding, padding)],
        dimension_numbers=("NCHW", "OIHW", "NCHW"))
    y = y + conv_b.reshape(1, -1, 1, 1)
    y = (y - run_mean.reshape(1, -1, 1, 1)) / jnp.sqrt(run_var.reshape(1, -1, 1, 1) + eps)
    y = y * gamma.reshape(1, -1, 1, 1) + beta.reshape(1, -1, 1, 1)
    return jnp.maximum(y, 0.0)


if __name__ == "__main__":
    # Small shapes consistent with the module: ConvBlock(4, 8, kernel_size=3, padding=1)
    N, Cin, H, W = 2, 4, 16, 16
    Cout, KH, KW = 8, 3, 3
    padding = 1

    key = jax.random.PRNGKey(0)
    k_x, k_w, k_b, k_g, k_be, k_m, k_v = jax.random.split(key, 7)

    x = jax.random.normal(k_x, (N, Cin, H, W), jnp.float32)
    w = jax.random.normal(k_w, (Cout, Cin, KH, KW), jnp.float32) * 0.1
    conv_b = jax.random.normal(k_b, (Cout,), jnp.float32) * 0.1
    gamma = 1.0 + 0.1 * jax.random.normal(k_g, (Cout,), jnp.float32)
    beta = 0.1 * jax.random.normal(k_be, (Cout,), jnp.float32)
    run_mean = 0.1 * jax.random.normal(k_m, (Cout,), jnp.float32)
    run_var = jax.random.uniform(k_v, (Cout,), jnp.float32, 0.5, 1.5)

    out = conv_block_forward(x, w, conv_b, gamma, beta, run_mean, run_var,
                             padding=padding)
    out = jax.block_until_ready(out)

    ref = _reference(x, w, conv_b, gamma, beta, run_mean, run_var, padding=padding)
    assert out.shape == (N, Cout, H, W), out.shape
    assert jnp.allclose(out, ref, atol=1e-4, rtol=1e-4), float(jnp.max(jnp.abs(out - ref)))

    print("KERNEL_OK")
</pallas_src>

<mosaic_0001>
module attributes {stable_mosaic.version = 11 : i64} {
  func.func @_conv_bn_relu_kernel(%arg0: i32, %arg1: memref<9x256xf32, #tpu.memory_space<vmem>>, %arg2: memref<1x4x256xf32, #tpu.memory_space<vmem>>, %arg3: memref<9x8x4xf32, #tpu.memory_space<vmem>>, %arg4: memref<8x1xf32, #tpu.memory_space<vmem>>, %arg5: memref<1x8x256xf32, #tpu.memory_space<vmem>>) attributes {dimension_semantics = [#tpu.dimension_semantics<parallel>], iteration_bounds = array<i64: 2>, scalar_prefetch = 0 : i64, scratch_operands = 0 : i64, tpu.core_type = #tpu.core_type<tc>, window_params = [{pipeline_mode = #tpu.pipeline_mode<synchronous>, transform_indices = @transform_0, window_bounds = array<i64: 9, 256>}, {transform_indices = @transform_1, window_bounds = array<i64: 1, 4, 256>}, {pipeline_mode = #tpu.pipeline_mode<synchronous>, transform_indices = @transform_2, window_bounds = array<i64: 9, 8, 4>}, {pipeline_mode = #tpu.pipeline_mode<synchronous>, transform_indices = @transform_3, window_bounds = array<i64: 8, 1>}, {transform_indices = @transform_4, window_bounds = array<i64: 1, 8, 256>}]} {
    %c0 = arith.constant 0 : index
    %c0_0 = arith.constant 0 : index
    %0 = vector.load %arg1[%c0, %c0_0] : memref<9x256xf32, #tpu.memory_space<vmem>>, vector<9x256xf32>
    %c0_1 = arith.constant 0 : index
    %c0_2 = arith.constant 0 : index
    %c0_3 = arith.constant 0 : index
    %1 = vector.load %arg3[%c0_1, %c0_2, %c0_3] : memref<9x8x4xf32, #tpu.memory_space<vmem>>, vector<9x8x4xf32>
    %c0_4 = arith.constant 0 : index
    %c0_5 = arith.constant 0 : index
    %2 = vector.load %arg4[%c0_4, %c0_5] : memref<8x1xf32, #tpu.memory_space<vmem>>, vector<8x1xf32>
    %c0_6 = arith.constant 0 : index
    %c0_7 = arith.constant 0 : index
    %c0_8 = arith.constant 0 : index
    %3 = vector.load %arg2[%c0_6, %c0_7, %c0_8] : memref<1x4x256xf32, #tpu.memory_space<vmem>>, vector<1x4x256xf32>
    %4 = vector.shape_cast %3 : vector<1x4x256xf32> to vector<4x256xf32>
    %c17_i32 = arith.constant 17 : i32
    %5 = tpu.dynamic_rotate %4 by %c17_i32 dim 1 : vector<4x256xf32>, i32 -> vector<4x256xf32>
    %6 = vector.extract_strided_slice %0 {offsets = [0, 0], sizes = [1, 256], strides = [1, 1]} : vector<9x256xf32> to vector<1x256xf32>
    %7 = vector.broadcast %6 : vector<1x256xf32> to vector<4x256xf32>
    %8 = arith.mulf %5, %7 : vector<4x256xf32>
    %9 = vector.extract_strided_slice %1 {offsets = [0, 0, 0], sizes = [1, 8, 4], strides = [1, 1, 1]} : vector<9x8x4xf32> to vector<1x8x4xf32>
    %10 = vector.shape_cast %9 : vector<1x8x4xf32> to vector<8x4xf32>
    %cst = arith.constant dense<0.000000e+00> : vector<8x256xf32>
    %11 = tpu.matmul %10, %8, %cst {dimension_numbers = #tpu.dot_dimension_numbers<[1], [0], [0], [1], [0, 0, 1, 1], [], []>} : vector<8x4xf32>, vector<4x256xf32>, vector<8x256xf32> -> vector<8x256xf32>
    %c16_i32 = arith.constant 16 : i32
    %12 = tpu.dynamic_rotate %4 by %c16_i32 dim 1 : vector<4x256xf32>, i32 -> vector<4x256xf32>
    %13 = vector.extract_strided_slice %0 {offsets = [1, 0], sizes = [1, 256], strides = [1, 1]} : vector<9x256xf32> to vector<1x256xf32>
    %14 = vector.broadcast %13 : vector<1x256xf32> to vector<4x256xf32>
    %15 = arith.mulf %12, %14 : vector<4x256xf32>
    %16 = vector.extract_strided_slice %1 {offsets = [1, 0, 0], sizes = [1, 8, 4], strides = [1, 1, 1]} : vector<9x8x4xf32> to vector<1x8x4xf32>
    %17 = vector.shape_cast %16 : vector<1x8x4xf32> to vector<8x4xf32>
    %cst_9 = arith.constant dense<0.000000e+00> : vector<8x256xf32>
    %18 = tpu.matmul %17, %15, %cst_9 {dimension_numbers = #tpu.dot_dimension_numbers<[1], [0], [0], [1], [0, 0, 1, 1], [], []>} : vector<8x4xf32>, vector<4x256xf32>, vector<8x256xf32> -> vector<8x256xf32>
    %19 = arith.addf %11, %18 : vector<8x256xf32>
    %c15_i32 = arith.constant 15 : i32
    %20 = tpu.dynamic_rotate %4 by %c15_i32 dim 1 : vector<4x256xf32>, i32 -> vector<4x256xf32>
    %21 = vector.extract_strided_slice %0 {offsets = [2, 0], sizes = [1, 256], strides = [1, 1]} : vector<9x256xf32> to vector<1x256xf32>
    %22 = vector.broadcast %21 : vector<1x256xf32> to vector<4x256xf32>
    %23 = arith.mulf %20, %22 : vector<4x256xf32>
    %24 = vector.extract_strided_slice %1 {offsets = [2, 0, 0], sizes = [1, 8, 4], strides = [1, 1, 1]} : vector<9x8x4xf32> to vector<1x8x4xf32>
    %25 = vector.shape_cast %24 : vector<1x8x4xf32> to vector<8x4xf32>
    %cst_10 = arith.constant dense<0.000000e+00> : vector<8x256xf32>
    %26 = tpu.matmul %25, %23, %cst_10 {dimension_numbers = #tpu.dot_dimension_numbers<[1], [0], [0], [1], [0, 0, 1, 1], [], []>} : vector<8x4xf32>, vector<4x256xf32>, vector<8x256xf32> -> vector<8x256xf32>
    %27 = arith.addf %19, %26 : vector<8x256xf32>
    %c1_i32 = arith.constant 1 : i32
    %28 = tpu.dynamic_rotate %4 by %c1_i32 dim 1 : vector<4x256xf32>, i32 -> vector<4x256xf32>
    %29 = vector.extract_strided_slice %0 {offsets = [3, 0], sizes = [1, 256], strides = [1, 1]} : vector<9x256xf32> to vector<1x256xf32>
    %30 = vector.broadcast %29 : vector<1x256xf32> to vector<4x256xf32>
    %31 = arith.mulf %28, %30 : vector<4x256xf32>
    %32 = vector.extract_strided_slice %1 {offsets = [3, 0, 0], sizes = [1, 8, 4], strides = [1, 1, 1]} : vector<9x8x4xf32> to vector<1x8x4xf32>
    %33 = vector.shape_cast %32 : vector<1x8x4xf32> to vector<8x4xf32>
    %cst_11 = arith.constant dense<0.000000e+00> : vector<8x256xf32>
    %34 = tpu.matmul %33, %31, %cst_11 {dimension_numbers = #tpu.dot_dimension_numbers<[1], [0], [0], [1], [0, 0, 1, 1], [], []>} : vector<8x4xf32>, vector<4x256xf32>, vector<8x256xf32> -> vector<8x256xf32>
    %35 = arith.addf %27, %34 : vector<8x256xf32>
    %36 = vector.extract_strided_slice %1 {offsets = [4, 0, 0], sizes = [1, 8, 4], strides = [1, 1, 1]} : vector<9x8x4xf32> to vector<1x8x4xf32>
    %37 = vector.shape_cast %36 : vector<1x8x4xf32> to vector<8x4xf32>
    %cst_12 = arith.constant dense<0.000000e+00> : vector<8x256xf32>
    %38 = tpu.matmul %37, %4, %cst_12 {dimension_numbers = #tpu.dot_dimension_numbers<[1], [0], [0], [1], [0, 0, 1, 1], [], []>} : vector<8x4xf32>, vector<4x256xf32>, vector<8x256xf32> -> vector<8x256xf32>
    %39 = arith.addf %35, %38 : vector<8x256xf32>
    %c255_i32 = arith.constant 255 : i32
    %40 = tpu.dynamic_rotate %4 by %c255_i32 dim 1 : vector<4x256xf32>, i32 -> vector<4x256xf32>
    %41 = vector.extract_strided_slice %0 {offsets = [5, 0], sizes = [1, 256], strides = [1, 1]} : vector<9x256xf32> to vector<1x256xf32>
    %42 = vector.broadcast %41 : vector<1x256xf32> to vector<4x256xf32>
    %43 = arith.mulf %40, %42 : vector<4x256xf32>
    %44 = vector.extract_strided_slice %1 {offsets = [5, 0, 0], sizes = [1, 8, 4], strides = [1, 1, 1]} : vector<9x8x4xf32> to vector<1x8x4xf32>
    %45 = vector.shape_cast %44 : vector<1x8x4xf32> to vector<8x4xf32>
    %cst_13 = arith.constant dense<0.000000e+00> : vector<8x256xf32>
    %46 = tpu.matmul %45, %43, %cst_13 {dimension_numbers = #tpu.dot_dimension_numbers<[1], [0], [0], [1], [0, 0, 1, 1], [], []>} : vector<8x4xf32>, vector<4x256xf32>, vector<8x256xf32> -> vector<8x256xf32>
    %47 = arith.addf %39, %46 : vector<8x256xf32>
    %c241_i32 = arith.constant 241 : i32
    %48 = tpu.dynamic_rotate %4 by %c241_i32 dim 1 : vector<4x256xf32>, i32 -> vector<4x256xf32>
    %49 = vector.extract_strided_slice %0 {offsets = [6, 0], sizes = [1, 256], strides = [1, 1]} : vector<9x256xf32> to vector<1x256xf32>
    %50 = vector.broadcast %49 : vector<1x256xf32> to vector<4x256xf32>
    %51 = arith.mulf %48, %50 : vector<4x256xf32>
    %52 = vector.extract_strided_slice %1 {offsets = [6, 0, 0], sizes = [1, 8, 4], strides = [1, 1, 1]} : vector<9x8x4xf32> to vector<1x8x4xf32>
    %53 = vector.shape_cast %52 : vector<1x8x4xf32> to vector<8x4xf32>
    %cst_14 = arith.constant dense<0.000000e+00> : vector<8x256xf32>
    %54 = tpu.matmul %53, %51, %cst_14 {dimension_numbers = #tpu.dot_dimension_numbers<[1], [0], [0], [1], [0, 0, 1, 1], [], []>} : vector<8x4xf32>, vector<4x256xf32>, vector<8x256xf32> -> vector<8x256xf32>
    %55 = arith.addf %47, %54 : vector<8x256xf32>
    %c240_i32 = arith.constant 240 : i32
    %56 = tpu.dynamic_rotate %4 by %c240_i32 dim 1 : vector<4x256xf32>, i32 -> vector<4x256xf32>
    %57 = vector.extract_strided_slice %0 {offsets = [7, 0], sizes = [1, 256], strides = [1, 1]} : vector<9x256xf32> to vector<1x256xf32>
    %58 = vector.broadcast %57 : vector<1x256xf32> to vector<4x256xf32>
    %59 = arith.mulf %56, %58 : vector<4x256xf32>
    %60 = vector.extract_strided_slice %1 {offsets = [7, 0, 0], sizes = [1, 8, 4], strides = [1, 1, 1]} : vector<9x8x4xf32> to vector<1x8x4xf32>
    %61 = vector.shape_cast %60 : vector<1x8x4xf32> to vector<8x4xf32>
    %cst_15 = arith.constant dense<0.000000e+00> : vector<8x256xf32>
    %62 = tpu.matmul %61, %59, %cst_15 {dimension_numbers = #tpu.dot_dimension_numbers<[1], [0], [0], [1], [0, 0, 1, 1], [], []>} : vector<8x4xf32>, vector<4x256xf32>, vector<8x256xf32> -> vector<8x256xf32>
    %63 = arith.addf %55, %62 : vector<8x256xf32>
    %c239_i32 = arith.constant 239 : i32
    %64 = tpu.dynamic_rotate %4 by %c239_i32 dim 1 : vector<4x256xf32>, i32 -> vector<4x256xf32>
    %65 = vector.extract_strided_slice %0 {offsets = [8, 0], sizes = [1, 256], strides = [1, 1]} : vector<9x256xf32> to vector<1x256xf32>
    %66 = vector.broadcast %65 : vector<1x256xf32> to vector<4x256xf32>
    %67 = arith.mulf %64, %66 : vector<4x256xf32>
    %68 = vector.extract_strided_slice %1 {offsets = [8, 0, 0], sizes = [1, 8, 4], strides = [1, 1, 1]} : vector<9x8x4xf32> to vector<1x8x4xf32>
    %69 = vector.shape_cast %68 : vector<1x8x4xf32> to vector<8x4xf32>
    %cst_16 = arith.constant dense<0.000000e+00> : vector<8x256xf32>
    %70 = tpu.matmul %69, %67, %cst_16 {dimension_numbers = #tpu.dot_dimension_numbers<[1], [0], [0], [1], [0, 0, 1, 1], [], []>} : vector<8x4xf32>, vector<4x256xf32>, vector<8x256xf32> -> vector<8x256xf32>
    %71 = arith.addf %63, %70 : vector<8x256xf32>
    %72 = vector.broadcast %2 : vector<8x1xf32> to vector<8x256xf32>
    %73 = arith.addf %71, %72 : vector<8x256xf32>
    %cst_17 = arith.constant 0.000000e+00 : f32
    %74 = vector.broadcast %cst_17 : f32 to vector<8x256xf32>
    %75 = arith.maximumf %73, %74 : vector<8x256xf32>
    %c0_18 = arith.constant 0 : index
    %c0_19 = arith.constant 0 : index
    %c0_20 = arith.constant 0 : index
    %76 = vector.load %arg5[%c0_18, %c0_19, %c0_20] : memref<1x8x256xf32, #tpu.memory_space<vmem>>, vector<1x8x256xf32>
    %77 = vector.shape_cast %76 : vector<1x8x256xf32> to vector<8x256xf32>
    %78 = vector.shape_cast %75 : vector<8x256xf32> to vector<1x8x256xf32>
    tpu.vector_store %arg5[%c0_18, %c0_19, %c0_20], %78 {strides = array<i32>} : memref<1x8x256xf32, #tpu.memory_space<vmem>>, vector<1x8x256xf32>,
    return
  }
  func.func @transform_0(%arg0: i32) -> (i32, i32) {
    %c0_i32 = arith.constant 0 : i32
    %c0_i32_0 = arith.constant 0 : i32
    %c0_i32_1 = arith.constant 0 : i32
    return %c0_i32, %c0_i32_0 : i32, i32
  }
  func.func @transform_1(%arg0: i32) -> (i32, i32, i32) {
    %c0_i32 = arith.constant 0 : i32
    %c0_i32_0 = arith.constant 0 : i32
    %c0_i32_1 = arith.constant 0 : i32
    return %arg0, %c0_i32, %c0_i32_0 : i32, i32, i32
  }
  func.func @transform_2(%arg0: i32) -> (i32, i32, i32) {
    %c0_i32 = arith.constant 0 : i32
    %c0_i32_0 = arith.constant 0 : i32
    %c0_i32_1 = arith.constant 0 : i32
    %c0_i32_2 = arith.constant 0 : i32
    return %c0_i32, %c0_i32_0, %c0_i32_1 : i32, i32, i32
  }
  func.func @transform_3(%arg0: i32) -> (i32, i32) {
    %c0_i32 = arith.constant 0 : i32
    %c0_i32_0 = arith.constant 0 : i32
    %c0_i32_1 = arith.constant 0 : i32
    return %c0_i32, %c0_i32_0 : i32, i32
  }
  func.func @transform_4(%arg0: i32) -> (i32, i32, i32) {
    %c0_i32 = arith.constant 0 : i32
    %c0_i32_0 = arith.constant 0 : i32
    %c0_i32_1 = arith.constant 0 : i32
    return %arg0, %c0_i32, %c0_i32_0 : i32, i32, i32
  }
}

</mosaic_0001>

<bundles_post_ra>
// kernel: tpu_custom_call.1
= control target key start
LH: loop header
LB: loop body
LE: loop exit
PB: predicated region body
PF: predicated region fallthrough
CT: control target
= control target key end

     0   :  { %9 = vsyncpa [#allocation3], 0  ;;  %s1284_s0 = inlined_call_operand.vmem [shape: f32[9,256], index: 0, kind: input, shape index: {}]   ;;  %s1285_s1 = inlined_call_operand.vmem [shape: f32[2,4,256], index: 1, kind: input, shape index: {}]   ;;  %s1286_s2 = inlined_call_operand.vmem [shape: f32[9,8,4], index: 2, kind: input, shape index: {}]   ;;  %s1287_s3 = inlined_call_operand.vmem [shape: f32[8,1], index: 3, kind: input, shape index: {}]   ;;  %s1288_s4 = inlined_call_operand.hbm [shape: f32[2,8,256], index: 4, kind: output, shape index: {}]  }
   0x1   :  { %11 = vsyncpa [#allocation3 + $0x1], 0  ;;  %s1087_s15 = smov 0   ;;  %s1089_s16 = smov 0  }
   0x2   :  { %s1091_s17 = smov 0   ;;  %s1093_s18 = smov 0  }
   0x3 LB: > { %s1108_s19 = sadd.s32 4294967295, %s1051_s18   ;;  %s887_s20 = sadd.s32 4294967294, %s1051_s18   ;;  %s1051_s18 = sphi %s1093_s18, %s1294_s18   ;;  %s1047_s17 = sphi %s1091_s17, %s1293_s17   ;;  %s1043_s16 = sphi %s1089_s16, %s1292_s16   ;;  %s1039_s15 = sphi %s1087_s15, %s1291_s15  }
   0x4   : > { %s1112_s21 = sadd.s32 1, %s1051_s18   ;;  %s113_s22 = sadd.s32 1, %s1047_s17 }
   0x5   : > { %s110_s23 = ssub.s32 %s1051_s18, %s1112_s21  ;;  %p123_p0 = scmp.ne.s32.totalorder %s1047_s17, %s1043_s16 }
   0x6   : > { %p111_p1 = scmp.eq.s32.totalorder %s110_s23, 0  ;;  %p124_p2 = scmp.eq.s32.totalorder %s1108_s19, 1 }
   0x7   : > { %p129_p3 = scmp.ne.s32.totalorder %s1043_s16, %s1039_s15  ;;  %p130_p4 = scmp.eq.s32.totalorder %s887_s20, 1 }
   0x8   : > { %s1123_s24 = scalar_select %p111_p1, %s1047_s17, %s113_s22  }
   0x9   : > { %p1125_p5 = por %p124_p2, %p123_p0  ;;  %p1129_p6 = por %p130_p4, %p129_p3 }
   0xa   : > { %p890_p7 = scmp.ge.s32.totalorder %s1051_s18, 1  ;;  %p165_p8 = scmp.lt.s32.totalorder %s1051_s18, 3 }
   0xc   : > { %p166_p9 = pnand %p890_p7, %p165_p8 }
   0xd   : > { %p191_p10 = scmp.lt.s32.totalorder (!%p166_p9), %s1108_s19, 1  ;;  %s1053_s6 = smov (!%p166_p9), 17  }
   0xe   : > { %169 = sbr.rel (%p166_p9) target bundleno = 351 (0x15f), region = 36  ;;  %s1054_s7 = smov (!%p166_p9), 16  }
   0xf   : > { %s1055_s8 = smov (!%p166_p9), 15   ;;  %s1056_s9 = smov (!%p166_p9), 1  }
  0x10   : > { %s1057_s10 = smov (!%p166_p9), 127   ;;  %s1058_s11 = smov (!%p166_p9), 113  }
  0x11   : > { %s1059_s12 = smov (!%p166_p9), 112   ;;  %s1060_s13 = smov (!%p166_p9), 111  }
  0x12   : > { %s1009_s30 = scalar_lea.hbm (!%p166_p9), %s1288_s4, 32 }
  0x13   : > { %s192_s27 = scalar_select %p191_p10, %s1108_s19, 1  ;;  %v221_v19 = vlaneseq  ;;  %v1149_v23 = vld [vmem:[%s1284_s0] sm:$0xff]  ;;  %v1154_v24 = vld [vmem:[%s1284_s0 + $0x8] sm:$0xff]  ;;  %vm250_vm1 = vcmask 1043456   ;;  %vm246_vm2 = vcmask 31744   ;;  %v202_v57 = vld [vmem:[%s1286_s2 + $0x10] sm:$0xff] }
  0x14   : > { %v226_v25 = vperm.slane %v1149_v23, 0  ;;  %v227_v26 = vperm.slane %v1154_v24, 0  ;;  %v200_v33 = vld [vmem:[%s1286_s2] sm:$0xff]  ;;  %v242_v35 = vperm.slane %v1149_v23, 1  ;;  %v243_v36 = vperm.slane %v1154_v24, 1  ;;  %v201_v46 = vld [vmem:[%s1286_s2 + $0x8] sm:$0xff] }
  0x15   : > { %s935_s28 = sshll.u32 %s192_s27, 3  ;;  %v1144_v21 = vand.u32 127, %v221_v19  ;;  %v358_v37 = vperm.slane %v1149_v23, 2  ;;  %v359_v38 = vperm.slane %v1154_v24, 2  ;;  %v425_v49 = vperm.slane %v1149_v23, 3  ;;  %v203_v58 = vld [vmem:[%s1286_s2 + $0x18] sm:$0xff] }
  0x16   : > { %s195_s5 = scalar_lea.vmem %s1285_s1, %s935_s28  ;;  %v426_v50 = vperm.slane %v1154_v24, 3  ;;  %v204_v59 = vld [vmem:[%s1286_s2 + $0x20] sm:$0xff]  ;;  %v544_v62 = vperm.slane %v1149_v23, 5  ;;  %v545_v63 = vperm.slane %v1154_v24, 5 }
  0x17   : > { %v210_v0 = vld [vmem:[%s195_s5] sm:$0xff]  ;;  %vm223_vm0 = vcmp.lt.s32.totalorder %v1144_v21, 17  ;;  %vm355_vm3 = vcmp.lt.s32.totalorder %v1144_v21, 15  ;;  %vm239_vm4 = vcmp.lt.s32.totalorder %v1144_v21, 16  ;;  %vm422_vm5 = vcmp.lt.s32.totalorder %v1144_v21, 1 }
  0x18   : > { %212 = vst [vmem:[#allocation1] ss:$2 sm:$0xff] %v210_v0  ;;  %v209_v61 = vld [vmem:[%s1287_s3] sm:$0xff]  ;;  %vm541_vm6 = vcmp.lt.s32.totalorder %v1144_v21, 127  ;;  %vm608_vm7 = vcmp.lt.s32.totalorder %v1144_v21, 113  ;;  %vm675_vm8 = vcmp.lt.s32.totalorder %v1144_v21, 112 }
  0x19   : > { %vm742_vm9 = vcmp.lt.s32.totalorder %v1144_v21, 111 }
  0x1f   : > { %v213_v1 = vld.sshfl [vmem:[#allocation1] sm:$0xff pattern:$0x75316420]  ;;  %v214_v2 = vld.sshfl [vmem:[#allocation1 + $0x8] sm:$0xff pattern:$0x75316420] }
  0x20   : > { %217 = vrot.lane.b32.xlu0 %v213_v1, %s1053_s6  ;;  %230 = vst [vmem:[#allocation1] ss:$2 sm:$0xff] %v210_v0 }
  0x27   : > { %v231_v3 = vld.sshfl [vmem:[#allocation1] sm:$0xff pattern:$0x75316420]  ;;  %v232_v4 = vld.sshfl [vmem:[#allocation1 + $0x8] sm:$0xff pattern:$0x75316420] }
  0x28   : > { %235 = vrot.lane.b32.xlu1 %v231_v3, %s1054_s7  ;;  %219 = vrot.lane.b32.xlu0 %v214_v2, %s1053_s6  ;;  %346 = vst [vmem:[#allocation1] ss:$2 sm:$0xff] %v210_v0 }
  0x2f   : > { %v347_v5 = vld.sshfl [vmem:[#allocation1] sm:$0xff pattern:$0x75316420]  ;;  %v348_v6 = vld.sshfl [vmem:[#allocation1 + $0x8] sm:$0xff pattern:$0x75316420] }
  0x30   : > { %237 = vrot.lane.b32.xlu1 %v232_v4, %s1054_s7  ;;  %413 = vst [vmem:[#allocation1] ss:$2 sm:$0xff] %v210_v0  ;;  %351 = vrot.lane.b32.xlu2 %v347_v5, %s1055_s8 }
  0x37   : > { %v415_v7 = vld.sshfl [vmem:[#allocation1 + $0x8] sm:$0xff pattern:$0x75316420]  ;;  %v414_v8 = vld.sshfl [vmem:[#allocation1] sm:$0xff pattern:$0x75316420] }
  0x38   : > { %420 = vrot.lane.b32.xlu1 %v415_v7, %s1056_s9  ;;  %418 = vrot.lane.b32.xlu0 %v414_v8, %s1056_s9  ;;  %480 = vst [vmem:[#allocation1] ss:$2 sm:$0xff] %v210_v0  ;;  %v611_v8 = vperm.slane %v1149_v23, 6 }
  0x39   : > { %353 = vrot.lane.b32.xlu2 %v348_v6, %s1055_s8  ;;  %v205_v6 = vld [vmem:[%s1286_s2 + $0x28] sm:$0xff]  ;;  %s188_s8 = sand.u32 1, %s1043_s16  }
  0x3a   : > { %s891_s9 = sshll.u32 %s188_s8, 4 }
  0x3b   : > { %s190_s14 = scalar_lea.vmem [#allocation2], %s891_s9 }
  0x3c   : > { %s825_s20 = sshll.u32 %s190_s14, 4  ;;  %s826_s20 = int_to_ptr.vmem [resolvable:$true] %s825_s20 }
  0x3f   : > { %v1140_v9 = vld.sshfl [vmem:[#allocation1] sm:$0xff pattern:$0x75316420]  ;;  %v1142_v10 = vld.sshfl [vmem:[#allocation1 + $0x8] sm:$0xff pattern:$0x75316420] }
  0x40   : > { %532 = vst [vmem:[#allocation1] ss:$2 sm:$0xff] %v210_v0 }
  0x47   : > { %v534_v11 = vld.sshfl [vmem:[#allocation1 + $0x8] sm:$0xff pattern:$0x75316420]  ;;  %v533_v12 = vld.sshfl [vmem:[#allocation1] sm:$0xff pattern:$0x75316420] }
  0x48   : > { %539 = vrot.lane.b32.xlu0 %v534_v11, %s1057_s10  ;;  %599 = vst [vmem:[#allocation1] ss:$2 sm:$0xff] %v210_v0  ;;  %537 = vrot.lane.b32.xlu2 %v533_v12, %s1057_s10  ;;  %s936_s10 = sshll.u32 %s1108_s19, 4  ;;  %s812_s19 = scalar_lea.sflag [#allocation3], %s188_s8 }
  0x4f   : > { %v600_v13 = vld.sshfl [vmem:[#allocation1] sm:$0xff pattern:$0x75316420]  ;;  %v601_v14 = vld.sshfl [vmem:[#allocation1 + $0x8] sm:$0xff pattern:$0x75316420] }
  0x50   : > { %604 = vrot.lane.b32.xlu1 %v600_v13, %s1058_s11  ;;  %666 = vst [vmem:[#allocation1] ss:$2 sm:$0xff] %v210_v0  ;;  %606 = vrot.lane.b32.xlu2 %v601_v14, %s1058_s11 }
  0x57   : > { %v668_v15 = vld.sshfl [vmem:[#allocation1 + $0x8] sm:$0xff pattern:$0x75316420]  ;;  %v667_v16 = vld.sshfl [vmem:[#allocation1] sm:$0xff pattern:$0x75316420] }
  0x58   : > { %673 = vrot.lane.b32.xlu1 %v668_v15, %s1059_s12  ;;  %671 = vrot.lane.b32.xlu0 %v667_v16, %s1059_s12  ;;  %733 = vst [vmem:[#allocation1] ss:$2 sm:$0xff] %v210_v0  ;;  %v1061_v0 = vmov 0   ;;  %v206_v15 = vld [vmem:[%s1286_s2 + $0x30] sm:$0xff]  ;;  %v678_v16 = vperm.slane %v1149_v23, 7 }
  0x59   : > { %985 = vset.pattern.permute.xlu1 %v1061_v0  ;;  %986 = vset.pattern.permute.xlu0 %v1061_v0  ;;  %v987_v23 = vld [vmem:[%s1284_s0 + $0x10] ss:$0 sm:$0xff] }
  0x5f   : > { %v735_v17 = vld.sshfl [vmem:[#allocation1 + $0x8] sm:$0xff pattern:$0x75316420]  ;;  %v734_v18 = vld.sshfl [vmem:[#allocation1] sm:$0xff pattern:$0x75316420] }
  0x60   : > { %740 = vrot.lane.b32.xlu0 %v735_v17, %s1060_s13  ;;  %738 = vrot.lane.b32.xlu2 %v734_v18, %s1060_s13  ;;  %v679_v17 = vperm.slane %v1154_v24, 7  ;;  %s823_s13 = scalar_lea.hbm %s1288_s4, %s936_s10 }
  0x61   : > { %802 = vperm.xlu1 %985, %v209_v61   ;;  %s827_s22 = sshll.u32 %s823_s13, 4  ;;  %s828_s22 = int_to_ptr.hbm [resolvable:$true] %s827_s22 }
  0x62   : > { %s1003_s23 = sshra.s32 %s828_s22, 4  ;;  %s1004_s23 = int_to_ptr.hbm [resolvable:$true] %s1003_s23 }
  0x63   : > { %s1005_s27 = scalar_lea.hbm %s1004_s23, 16  ;;  %p1010_p0 = scmp.lt.s32.totalorder %s1004_s23, %s1288_s4 }
  0x64   : > { %p1006_p11 = scmp.ne.s32.totalorder %s1004_s23, %s1005_s27  ;;  %p1011_p1 = scmp.lt.s32.totalorder %s1009_s30, %s1005_s27 }
  0x66   : > { %p1007_p12 = pnand %p1006_p11, %p1125_p5  ;;  %p1012_p2 = por %p1011_p1, %p1010_p0 }
  0x68   : > { %p1008_p13 = pneg %p1007_p12 }
  0x6a   : > { %p1013_p3 = pnand %p1012_p2, %p1008_p13 }
  0x8a   : > { %v352_v22 = vpop.permute.xlu2 %351 }
  0x92   : > { %v218_v20 = vpop.permute.xlu0 %217 }
  0x93   : > { %v354_v34 = vpop.permute.xlu2 %353 }
  0x94   : > { %v356_v39 = vsel %vm355_vm3, %v352_v22, %v354_v34  ;;  %v357_v40 = vsel %vm355_vm3, %v354_v34, %v352_v22  ;;  %v208_v34 = vld [vmem:[%s1286_s2 + $0x40] sm:$0xff] }
  0x95   : > { %v360_v47 = vmul.f32 %v358_v37, %v357_v40  ;;  %v361_v48 = vmul.f32 %v359_v38, %v356_v39 }
  0x9a   : > { %v236_v27 = vpop.permute.xlu1 %235  ;;  %v220_v28 = vpop.permute.xlu0 %219 }
  0x9b   : > { %v224_v29 = vsel %vm223_vm0, %v218_v20, %v220_v28  ;;  %v225_v30 = vsel %vm223_vm0, %v220_v28, %v218_v20 }
  0x9c   : > { %v228_v31 = vmul.f32 %v226_v25, %v225_v30  ;;  %v229_v32 = vmul.f32 %v227_v26, %v224_v29 }
  0x9e   : > { %898 = vmatpush.msk.msra.mxu2 %vm250_vm1, %v228_v31  ;;  %900 = vmatpush.msk.msra.mxu3 %vm250_vm1, %v229_v32 }
  0x9f   : > { %899 = vmatmul.msk.f32.vlgmr.msra.gmra.mxu2 %vm246_vm2, %v200_v33  ;;  %901 = vmatmul.msk.f32.vlgmr.msra.gmra.mxu3 %vm246_vm2, %v200_v33 }
  0xa2   : > { %v238_v41 = vpop.permute.xlu1 %237  ;;  %v538_v60 = vpop.permute.xlu2 %537 }
  0xa3   : > { %v240_v42 = vsel %vm239_vm4, %v236_v27, %v238_v41  ;;  %v241_v43 = vsel %vm239_vm4, %v238_v41, %v236_v27  ;;  %v207_v27 = vld [vmem:[%s1286_s2 + $0x38] sm:$0xff] }
  0xa4   : > { %v244_v44 = vmul.f32 %v242_v35, %v241_v43  ;;  %v245_v45 = vmul.f32 %v243_v36, %v240_v42 }
  0xa6   : > { %894 = vmatpush.msk.msra.mxu0 %vm250_vm1, %v244_v44  ;;  %896 = vmatpush.msk.msra.mxu1 %vm250_vm1, %v245_v45 }
  0xa7   : > { %895 = vmatmul.msk.f32.vlgmr.msra.gmra.mxu0 %vm246_vm2, %v201_v46  ;;  %897 = vmatmul.msk.f32.vlgmr.msra.gmra.mxu1 %vm246_vm2, %v201_v46 }
  0xa8   : > { %902 = vmatpush.msk.msrb.mxu0 %vm250_vm1, %v360_v47  ;;  %904 = vmatpush.msk.msrb.mxu1 %vm250_vm1, %v361_v48 }
  0xaa   : > { %910 = vmatpush.msk.msra.mxu0 %vm250_vm1, %v1140_v9  ;;  %912 = vmatpush.msk.msra.mxu1 %vm250_vm1, %v1142_v10  ;;  %v421_v51 = vpop.permute.xlu1 %420  ;;  %v419_v52 = vpop.permute.xlu0 %418  ;;  %v612_v9 = vperm.slane %v1154_v24, 6  ;;  %v988_v24 = vld [vmem:[%s1284_s0 + $0x18] ss:$0 sm:$0xff] }
  0xab   : > { %v423_v53 = vsel %vm422_vm5, %v419_v52, %v421_v51  ;;  %v424_v54 = vsel %vm422_vm5, %v421_v51, %v419_v52  ;;  %v607_v7 = vpop.permute.xlu2 %606 }
  0xac   : > { %v427_v55 = vmul.f32 %v425_v49, %v424_v54  ;;  %v428_v56 = vmul.f32 %v426_v50, %v423_v53 }
  0xae   : > { %906 = vmatpush.msk.msrb.mxu2 %vm250_vm1, %v427_v55  ;;  %908 = vmatpush.msk.msrb.mxu3 %vm250_vm1, %v428_v56 }
  0xaf   : > { %903 = vmatmul.msk.f32.vlgmr.msrb.gmra.mxu0 %vm246_vm2, %v202_v57  ;;  %905 = vmatmul.msk.f32.vlgmr.msrb.gmra.mxu1 %vm246_vm2, %v202_v57 }
  0xb0   : > { %907 = vmatmul.msk.f32.vlgmr.msrb.gmra.mxu2 %vm246_vm2, %v203_v58  ;;  %909 = vmatmul.msk.f32.vlgmr.msrb.gmra.mxu3 %vm246_vm2, %v203_v58 }
  0xb7   : > { %911 = vmatmul.msk.f32.vlgmr.msra.gmra.mxu0 %vm246_vm2, %v204_v59  ;;  %913 = vmatmul.msk.f32.vlgmr.msra.gmra.mxu1 %vm246_vm2, %v204_v59 }
  0xba   : > { %v540_v1 = vpop.permute.xlu0 %539  ;;  %v739_v28 = vpop.permute.xlu2 %738 }
  0xbb   : > { %v542_v2 = vsel %vm541_vm6, %v538_v60, %v540_v1  ;;  %v543_v3 = vsel %vm541_vm6, %v540_v1, %v538_v60 }
  0xbc   : > { %v546_v4 = vmul.f32 %v544_v62, %v542_v2  ;;  %v547_v5 = vmul.f32 %v545_v63, %v543_v3 }
  0xbe   : > { %914 = vmatpush.msk.msra.mxu2 %vm250_vm1, %v546_v4  ;;  %916 = vmatpush.msk.msra.mxu3 %vm250_vm1, %v547_v5 }
  0xbf   : > { %915 = vmatmul.msk.f32.vlgmr.msra.gmra.mxu2 %vm246_vm2, %v205_v6  ;;  %917 = vmatmul.msk.f32.vlgmr.msra.gmra.mxu3 %vm246_vm2, %v205_v6 }
  0xc2   : > { %v605_v10 = vpop.permute.xlu1 %604 }
  0xc3   : > { %v609_v11 = vsel %vm608_vm7, %v605_v10, %v607_v7  ;;  %v610_v12 = vsel %vm608_vm7, %v607_v7, %v605_v10 }
  0xc4   : > { %v613_v13 = vmul.f32 %v611_v8, %v609_v11  ;;  %v614_v14 = vmul.f32 %v612_v9, %v610_v12 }
  0xc6   : > { %918 = vmatpush.msk.msrb.mxu0 %vm250_vm1, %v613_v13  ;;  %920 = vmatpush.msk.msrb.mxu1 %vm250_vm1, %v614_v14 }
  0xc7   : > { %919 = vmatmul.msk.f32.vlgmr.msrb.gmra.mxu0 %vm246_vm2, %v206_v15  ;;  %921 = vmatmul.msk.f32.vlgmr.msrb.gmra.mxu1 %vm246_vm2, %v206_v15 }
  0xca   : > { %v674_v18 = vpop.permute.xlu1 %673  ;;  %v672_v19 = vpop.permute.xlu0 %671 }
  0xcb   : > { %v676_v20 = vsel %vm675_vm8, %v672_v19, %v674_v18  ;;  %v677_v22 = vsel %vm675_vm8, %v674_v18, %v672_v19 }
  0xcc   : > { %v680_v25 = vmul.f32 %v678_v16, %v676_v20  ;;  %v681_v26 = vmul.f32 %v679_v17, %v677_v22 }
  0xce   : > { %922 = vmatpush.msk.msrb.mxu2 %vm250_vm1, %v680_v25  ;;  %924 = vmatpush.msk.msrb.mxu3 %vm250_vm1, %v681_v26 }
  0xcf   : > { %923 = vmatmul.msk.f32.vlgmr.msrb.gmra.mxu2 %vm246_vm2, %v207_v27  ;;  %925 = vmatmul.msk.f32.vlgmr.msrb.gmra.mxu3 %vm246_vm2, %v207_v27 }
  0xd2   : > { %v741_v29 = vpop.permute.xlu0 %740 }
  0xd3   : > { %v743_v30 = vsel %vm742_vm9, %v739_v28, %v741_v29  ;;  %v744_v31 = vsel %vm742_vm9, %v741_v29, %v739_v28  ;;  %v803_v0 = vpop.permute.xlu1 %802 }
  0xd4   : > { %v747_v32 = vmul.f32 %v987_v23, %v743_v30  ;;  %v748_v33 = vmul.f32 %v988_v24, %v744_v31 }
  0xd6   : > { %926 = vmatpush.msk.msra.mxu0 %vm250_vm1, %v747_v32  ;;  %928 = vmatpush.msk.msra.mxu1 %vm250_vm1, %v748_v33 }
  0xd7   : > { %927 = vmatmul.msk.f32.vlgmr.msra.gmra.mxu0 %vm246_vm2, %v208_v34  ;;  %929 = vmatmul.msk.f32.vlgmr.msra.gmra.mxu1 %vm246_vm2, %v208_v34 }
 0x122   : > { %v323_v36 = vpop.f32.mrf.mxu2  ;;  %v343_v37 = vpop.f32.mrf.mxu3 }
 0x124   : > { %v274_v21 = vpop.f32.mrf.mxu0  ;;  %v294_v35 = vpop.f32.mrf.mxu1 }
 0x125   : > { %v324_v40 = vadd.f32 %v323_v36, %v274_v21  ;;  %v344_v41 = vadd.f32 %v343_v37, %v294_v35 }
 0x12c   : > { %v388_v38 = vpop.f32.mrf.mxu0  ;;  %v408_v39 = vpop.f32.mrf.mxu1 }
 0x12d   : > { %v411_v44 = vadd.f32 %v388_v38, %v324_v40  ;;  %v412_v45 = vadd.f32 %v408_v39, %v344_v41 }
 0x133   : > { %v455_v42 = vpop.f32.mrf.mxu2  ;;  %v475_v43 = vpop.f32.mrf.mxu3 }
 0x134   : > { %v507_v46 = vpop.f32.mrf.mxu0  ;;  %v527_v47 = vpop.f32.mrf.mxu1  ;;  %v478_v48 = vadd.f32 %v455_v42, %v411_v44  ;;  %v479_v49 = vadd.f32 %v475_v43, %v412_v45 }
 0x136   : > { %v530_v52 = vadd.f32 %v507_v46, %v478_v48  ;;  %v531_v53 = vadd.f32 %v527_v47, %v479_v49 }
 0x142   : > { %v574_v50 = vpop.f32.mrf.mxu2  ;;  %v594_v51 = vpop.f32.mrf.mxu3 }
 0x143   : > { %v597_v56 = vadd.f32 %v574_v50, %v530_v52  ;;  %v598_v57 = vadd.f32 %v594_v51, %v531_v53 }
 0x144   : > { %v641_v54 = vpop.f32.mrf.mxu0  ;;  %v661_v55 = vpop.f32.mrf.mxu1 }
 0x145   : > { %v664_v58 = vadd.f32 %v641_v54, %v597_v56  ;;  %v665_v59 = vadd.f32 %v661_v55, %v598_v57 }
 0x152   : > { %v708_v60 = vpop.f32.mrf.mxu2  ;;  %v728_v61 = vpop.f32.mrf.mxu3 }
 0x153   : > { %v731_v62 = vadd.f32 %v708_v60, %v664_v58  ;;  %v732_v63 = vadd.f32 %v728_v61, %v665_v59 }
 0x154   : > { %v775_v1 = vpop.f32.mrf.mxu0  ;;  %v795_v2 = vpop.f32.mrf.mxu1 }
 0x155   : > { %v798_v3 = vadd.f32 %v775_v1, %v731_v62  ;;  %v799_v4 = vadd.f32 %v795_v2, %v732_v63 }
 0x157   : > { %v805_v5 = vadd.f32 %v803_v0, %v798_v3  ;;  %v806_v6 = vadd.f32 %v803_v0, %v799_v4 }
 0x159   : > { %v807_v7 = vmax.f32 %v805_v5, 0.0  ;;  %v808_v8 = vmax.f32 %v806_v6, 0.0 }
 0x15b   : > { %809 = vst [vmem:[%s190_s14] sm:$0xff] %v807_v7 }
 0x15c   : > { %810 = vst [vmem:[%s190_s14 + $0x8] sm:$0xff] %v808_v8 }
 0x15d   : > { %1016 = shalt.err (!%p1013_p3)
}
 0x15e   : > { %937 = dma.vmem_to_hbm [thread:$0]  (%p1125_p5), %s826_s20, 256, %s828_s22, %s812_s19  }
 0x15f PF: > { %p943_p4 = scmp.ge.s32.totalorder %s1051_s18, 2  ;;  %s839_s7 = sand.u32 1, %s1039_s15  }
 0x160   : > { %s840_s8 = scalar_lea.sflag [#allocation3], %s839_s7 }
 0x161   : > { %p940_p7 = pnand %p943_p4, %p1129_p6 }
 0x163   : > { %p941_p8 = pneg %p940_p7 }
 0x165   : > { %1034 = dma.done.wait (%p941_p8), %s840_s8, 256  }
 0x166   : > { %1036 = vsyncadd (%p941_p8), %s840_s8, 4294967040  ;;  %p14_p9 = scmp.ge.s32.totalorder %s1112_s21, 4   ;;  %s1291_s15 = smov %s1043_s16 }
 0x167   : > { %s1292_s16 = smov %s1047_s17  ;;  %s1293_s17 = smov %s1123_s24 }
 0x168   : > { %s1294_s18 = smov %s1112_s21  ;;  %16 = sbr.rel (!%p14_p9) target bundleno = 3 (0x3), region = 71 }
 0x16d   :  { %846 = vsyncpa [#allocation3], 1 }
 0x16e   :  { %848 = vsyncpa [#allocation3 + $0x1], 1 }

</bundles_post_ra>
